<compile_context>
chip_gen: v5e
topology: v5e:2x2
jax: 0.10.0
libtpu: 0.0.40
codegen_flags: <defaults>
</compile_context>

<pallas_src>
import functools
import math

import jax
import jax.numpy as jnp
from jax.experimental import pallas as pl
from jax.experimental.pallas import tpu as pltpu

SCALING_FACTOR = 0.18215      # _vae.config.scaling_factor (SD VAE default)
LOG_SCALING = math.log(SCALING_FACTOR)
LATENT_CH = 4                 # latent channels
ENC_OUT_CH = 2 * LATENT_CH    # encoder emits mean+logvar channels
KERNEL = 4                    # synthetic encoder conv: kernel 4, stride 4, valid
STRIDE = 4


# ---------------------------------------------------------------------------
# Fused kernel: folded conv-chain matmul + DiagonalGaussian sample (+ scaling)
#   a_ref     : (K, TILE_M)   im2col^T block, pixels on the lane axis
#   noise_ref : (4, TILE_M)   N(0,1) noise for posterior.sample()
#   wf_ref    : (8, K)        folded weight  (mean rows pre-scaled)
#   bf_ref    : (8, 1)        folded bias    (mean rows pre-scaled), f32
#   o_ref     : (4, TILE_M)   scaled latent sample
# ---------------------------------------------------------------------------
def _vae_encode_kernel(a_ref, noise_ref, wf_ref, bf_ref, o_ref, *, log_scaling):
    # One fused matmul: encoder conv + (h1+h2) + quant_conv (+ mean scaling).
    # (8, K) @ (K, TILE_M) -> (8, TILE_M), f32 accumulation on the MXU.
    moments = (jnp.dot(wf_ref[...], a_ref[...],
                       preferred_element_type=jnp.float32)
               + bf_ref[...])
    mean_scaled = moments[:LATENT_CH, :]                      # already * scaling
    logvar = jnp.clip(moments[LATENT_CH:, :], -30.0, 20.0)    # diffusers clamp
    std_scaled = jnp.exp(0.5 * logvar + log_scaling)          # folds * scaling
    o_ref[...] = mean_scaled + std_scaled * noise_ref[...]


# ---------------------------------------------------------------------------
# VAE_encode_multiview.forward
#   x     : (B, C, H, W)        NCHW input image
#   noise : (B, 4, H/4, W/4)    N(0,1) noise used by posterior.sample()
# ---------------------------------------------------------------------------
def vae_encode_multiview(x, params, noise, patch_num=4, tile_m=16384,
                         use_bf16_matmul=True):
    B, C, H, W = x.shape
    # h2 == h1 identity needs patch boundaries aligned with the stride-4 grid.
    assert H % (patch_num * STRIDE) == 0 and W % (patch_num * STRIDE) == 0
    Ho, Wo = H // STRIDE, W // STRIDE
    M = B * Ho * Wo
    K = C * KERNEL * KERNEL
    compute_dtype = jnp.bfloat16 if use_bf16_matmul else jnp.float32

    # --- fold the whole linear chain into one (8, K) matmul (tiny, wrapper) ---
    # moments = quant_w @ (2 * (enc_w @ a + enc_b)) + quant_b
    #         = (2*quant_w@enc_w) @ a + (2*quant_w@enc_b + quant_b)
    wenc = params["enc_w"].reshape(ENC_OUT_CH, K).astype(jnp.float32)
    benc = params["enc_b"].reshape(ENC_OUT_CH, 1).astype(jnp.float32)
    wq = params["quant_w"].astype(jnp.float32)
    bq = params["quant_b"].reshape(ENC_OUT_CH, 1).astype(jnp.float32)
    w_f = 2.0 * (wq @ wenc)
    b_f = 2.0 * (wq @ benc) + bq
    row_scale = jnp.concatenate(
        [jnp.full((LATENT_CH, 1), SCALING_FACTOR, jnp.float32),
         jnp.ones((LATENT_CH, 1), jnp.float32)], axis=0)
    w_f = (w_f * row_scale).astype(compute_dtype)
    b_f = b_f * row_scale                                     # stays f32

    # --- layout plumbing (lane-dense): pixels on the 128-lane axis -----------
    # Cast BEFORE the transpose (one half-width pass if bf16); allow_input_fusion
    # below additionally lets XLA fuse this transpose into the pallas operand.
    a_t = x.astype(compute_dtype).reshape(B, C, Ho, KERNEL, Wo, KERNEL)
    a_t = a_t.transpose(1, 3, 5, 0, 2, 4).reshape(K, M)   # K idx = c*16+kh*4+kw
    noise_t = noise.astype(jnp.float32).transpose(1, 0, 2, 3).reshape(LATENT_CH, M)

    # --- tiling: NO padding pass; ragged last block handled by Pallas --------
    tile_eff = max(128, (tile_m // 128) * 128)
    m128 = pl.cdiv(M, 128) * 128
    tile_eff = min(tile_eff, m128)
    # Keep >= 2 grid steps when the pixel axis allows it, so the ("parallel",)
    # axis still shards across v7x's two TensorCores.
    if m128 >= 256 and pl.cdiv(M, tile_eff) < 2:
        tile_eff = pl.cdiv(pl.cdiv(m128, 2), 128) * 128
    grid = (pl.cdiv(M, tile_eff),)

    a_item = jnp.dtype(compute_dtype).itemsize
    cost = pl.CostEstimate(
        flops=M * (2 * ENC_OUT_CH * K + 8 * LATENT_CH),
        transcendentals=M * LATENT_CH,
        bytes_accessed=(a_item * K * M                        # im2col^T read
                        + 4 * LATENT_CH * M                   # noise read
                        + 4 * LATENT_CH * M                   # output write
                        + a_item * ENC_OUT_CH * K + 4 * ENC_OUT_CH),
    )

    out = pl.pallas_call(
        functools.partial(_vae_encode_kernel, log_scaling=LOG_SCALING),
        out_shape=jax.ShapeDtypeStruct((LATENT_CH, M), jnp.float32),
        grid_spec=pltpu.PrefetchScalarGridSpec(
            num_scalar_prefetch=0,
            grid=grid,
            in_specs=[
                pl.BlockSpec((K, tile_eff), lambda i: (0, i)),
                pl.BlockSpec((LATENT_CH, tile_eff), lambda i: (0, i)),
                pl.BlockSpec((ENC_OUT_CH, K), lambda i: (0, 0)),
                pl.BlockSpec((ENC_OUT_CH, 1), lambda i: (0, 0)),
            ],
            out_specs=pl.BlockSpec((LATENT_CH, tile_eff), lambda i: (0, i)),
        ),
        compiler_params=pltpu.CompilerParams(
            dimension_semantics=("parallel",),
            vmem_limit_bytes=32 * 1024 * 1024,
            allow_input_fusion=[True, True, False, False],
        ),
        cost_estimate=cost,
    )(a_t, noise_t, w_f, b_f)

    # (4, M) -> (B, 4, Ho, Wo) NCHW
    # TODO(synk): when Wo >= 128, index noise/out natively in NCHW via a (B, Ho)
    # grid to also drop this transpose and the noise transpose above.
    return out.reshape(LATENT_CH, B, Ho, Wo).transpose(1, 0, 2, 3)


# ---------------------------------------------------------------------------
# Pure-JAX reference: the FULL original forward (whole-image encode, unfold,
# per-patch encode, reassembly, h1+h2, quant_conv, sample, scale).
# ---------------------------------------------------------------------------
def _ref_encoder(x_nchw, enc_w, enc_b):
    B, C, H, W = x_nchw.shape
    Ho, Wo = H // STRIDE, W // STRIDE
    patches = x_nchw.reshape(B, C, Ho, KERNEL, Wo, KERNEL)
    patches = patches.transpose(0, 2, 4, 1, 3, 5).reshape(B * Ho * Wo, -1)
    out = patches @ enc_w.reshape(ENC_OUT_CH, -1).T + enc_b
    return out.reshape(B, Ho, Wo, ENC_OUT_CH).transpose(0, 3, 1, 2)


def _ref_forward(x, params, noise, patch_num=4):
    B, C1, H1, W1 = x.shape
    h1 = _ref_encoder(x, params["enc_w"], params["enc_b"])
    _, C2, H2, W2 = h1.shape
    p = H1 // patch_num
    xp = x.reshape(B, C1, patch_num, p, patch_num, p)
    xp = xp.transpose(0, 2, 4, 1, 3, 5).reshape(-1, C1, p, p)
    h2 = _ref_encoder(xp, params["enc_w"], params["enc_b"])
    h2 = h2.reshape(B, patch_num, patch_num, C2, H2 // patch_num, W2 // patch_num)
    h2 = h2.transpose(0, 3, 1, 4, 2, 5).reshape(B, C2, H2, W2)
    h = h1 + h2
    moments = (jnp.einsum("oc,bchw->bohw", params["quant_w"], h)
               + params["quant_b"][None, :, None, None])
    mean, logvar = moments[:, :LATENT_CH], moments[:, LATENT_CH:]
    std = jnp.exp(0.5 * jnp.clip(logvar, -30.0, 20.0))
    return (mean + std * noise) * SCALING_FACTOR


if __name__ == "__main__":
    key = jax.random.PRNGKey(0)
    (k_w, k_b, k_qw, k_qb,
     k_x1, k_n1, k_x2, k_n2, k_x3, k_n3) = jax.random.split(key, 10)

    C_IN = 3
    params = {
        # encoder conv: Conv2d(C_IN -> 2*latent, kernel=4, stride=4)
        "enc_w": 0.1 * jax.random.normal(
            k_w, (ENC_OUT_CH, C_IN, KERNEL, KERNEL), dtype=jnp.float32),
        "enc_b": 0.1 * jax.random.normal(k_b, (ENC_OUT_CH,), dtype=jnp.float32),
        # quant_conv: Conv2d(8 -> 8, kernel=1)
        "quant_w": 0.1 * jax.random.normal(
            k_qw, (ENC_OUT_CH, ENC_OUT_CH), dtype=jnp.float32),
        "quant_b": 0.1 * jax.random.normal(k_qb, (ENC_OUT_CH,), dtype=jnp.float32),
    }

    run_f32 = jax.jit(lambda a, p, n: vae_encode_multiview(
        a, p, n, tile_m=128, use_bf16_matmul=False))
    run_bf16 = jax.jit(lambda a, p, n: vae_encode_multiview(a, p, n))

    # Case 1: multi-tile grid with a ragged last block (M = 2*12*12 = 288 ->
    # blocks of 128/128/32), strict f32 path vs the full dual-path reference.
    B1, H1, W1 = 2, 48, 48
    x1 = jax.random.normal(k_x1, (B1, C_IN, H1, W1), dtype=jnp.float32)
    n1 = jax.random.normal(
        k_n1, (B1, LATENT_CH, H1 // STRIDE, W1 // STRIDE), dtype=jnp.float32)
    out1 = jax.block_until_ready(run_f32(x1, params, n1))
    ref1 = _ref_forward(x1, params, n1)
    assert out1.shape == (B1, LATENT_CH, H1 // STRIDE, W1 // STRIDE), out1.shape
    assert jnp.allclose(out1, ref1, atol=1e-4, rtol=1e-4), "case1 (f32) mismatch"

    # Case 2: tiny single-block path (M = 32 < 128 lanes), default bf16 inputs.
    B2, H2 = 2, 16
    x2 = jax.random.normal(k_x2, (B2, C_IN, H2, H2), dtype=jnp.float32)
    n2 = jax.random.normal(
        k_n2, (B2, LATENT_CH, H2 // STRIDE, H2 // STRIDE), dtype=jnp.float32)
    out2 = jax.block_until_ready(run_bf16(x2, params, n2))
    ref2 = _ref_forward(x2, params, n2)
    assert out2.shape == (B2, LATENT_CH, H2 // STRIDE, H2 // STRIDE), out2.shape
    assert jnp.allclose(out2, ref2, atol=2e-2, rtol=2e-2), "case2 (bf16) mismatch"

    # Case 3: grid>=2 guard engaged (M = 1024 -> two 512-lane blocks), bf16.
    B3, H3 = 1, 128
    x3 = jax.random.normal(k_x3, (B3, C_IN, H3, H3), dtype=jnp.float32)
    n3 = jax.random.normal(
        k_n3, (B3, LATENT_CH, H3 // STRIDE, H3 // STRIDE), dtype=jnp.float32)
    out3 = jax.block_until_ready(run_bf16(x3, params, n3))
    ref3 = _ref_forward(x3, params, n3)
    assert out3.shape == (B3, LATENT_CH, H3 // STRIDE, H3 // STRIDE), out3.shape
    assert jnp.allclose(out3, ref3, atol=2e-2, rtol=2e-2), "case3 (bf16) mismatch"

    print("KERNEL_OK")
</pallas_src>

<mosaic_0001>
module attributes {stable_mosaic.version = 11 : i64} {
  func.func @_vae_encode_kernel(%arg0: i32, %arg1: memref<48x128xf32, #tpu.memory_space<vmem>>, %arg2: memref<4x128xf32, #tpu.memory_space<vmem>>, %arg3: memref<8x48xf32, #tpu.memory_space<vmem>>, %arg4: memref<8x1xf32, #tpu.memory_space<vmem>>, %arg5: memref<4x128xf32, #tpu.memory_space<vmem>>) attributes {dimension_semantics = [#tpu.dimension_semantics<parallel>], iteration_bounds = array<i64: 3>, scalar_prefetch = 0 : i64, scratch_operands = 0 : i64, tpu.core_type = #tpu.core_type<tc>, window_params = [{transform_indices = @transform_0, window_bounds = array<i64: 48, 128>}, {transform_indices = @transform_1, window_bounds = array<i64: 4, 128>}, {pipeline_mode = #tpu.pipeline_mode<synchronous>, transform_indices = @transform_2, window_bounds = array<i64: 8, 48>}, {pipeline_mode = #tpu.pipeline_mode<synchronous>, transform_indices = @transform_3, window_bounds = array<i64: 8, 1>}, {transform_indices = @transform_4, window_bounds = array<i64: 4, 128>}]} {
    %c0 = arith.constant 0 : index
    %c0_0 = arith.constant 0 : index
    %0 = vector.load %arg3[%c0, %c0_0] : memref<8x48xf32, #tpu.memory_space<vmem>>, vector<8x48xf32>
    %c0_1 = arith.constant 0 : index
    %c0_2 = arith.constant 0 : index
    %1 = vector.load %arg1[%c0_1, %c0_2] : memref<48x128xf32, #tpu.memory_space<vmem>>, vector<48x128xf32>
    %cst = arith.constant dense<0.000000e+00> : vector<8x128xf32>
    %2 = tpu.matmul %0, %1, %cst {dimension_numbers = #tpu.dot_dimension_numbers<[1], [0], [0], [1], [0, 0, 1, 1], [], []>} : vector<8x48xf32>, vector<48x128xf32>, vector<8x128xf32> -> vector<8x128xf32>
    %c0_3 = arith.constant 0 : index
    %c0_4 = arith.constant 0 : index
    %3 = vector.load %arg4[%c0_3, %c0_4] : memref<8x1xf32, #tpu.memory_space<vmem>>, vector<8x1xf32>
    %4 = vector.broadcast %3 : vector<8x1xf32> to vector<8x128xf32>
    %5 = arith.addf %2, %4 : vector<8x128xf32>
    %6 = vector.extract_strided_slice %5 {offsets = [0, 0], sizes = [4, 128], strides = [1, 1]} : vector<8x128xf32> to vector<4x128xf32>
    %7 = vector.extract_strided_slice %5 {offsets = [4, 0], sizes = [4, 128], strides = [1, 1]} : vector<8x128xf32> to vector<4x128xf32>
    %cst_5 = arith.constant -3.000000e+01 : f32
    %cst_6 = arith.constant 2.000000e+01 : f32
    %8 = vector.broadcast %cst_5 : f32 to vector<4x128xf32>
    %9 = arith.maximumf %8, %7 : vector<4x128xf32>
    %10 = vector.broadcast %cst_6 : f32 to vector<4x128xf32>
    %11 = arith.minimumf %10, %9 : vector<4x128xf32>
    %cst_7 = arith.constant 5.000000e-01 : f32
    %12 = vector.broadcast %cst_7 : f32 to vector<4x128xf32>
    %13 = arith.mulf %12, %11 : vector<4x128xf32>
    %cst_8 = arith.constant -1.70292473 : f32
    %14 = vector.broadcast %cst_8 : f32 to vector<4x128xf32>
    %15 = arith.addf %13, %14 : vector<4x128xf32>
    %16 = math.exp %15 : vector<4x128xf32>
    %c0_9 = arith.constant 0 : index
    %c0_10 = arith.constant 0 : index
    %17 = vector.load %arg2[%c0_9, %c0_10] : memref<4x128xf32, #tpu.memory_space<vmem>>, vector<4x128xf32>
    %18 = arith.mulf %16, %17 : vector<4x128xf32>
    %19 = arith.addf %6, %18 : vector<4x128xf32>
    %c0_11 = arith.constant 0 : index
    %c0_12 = arith.constant 0 : index
    %20 = vector.load %arg5[%c0_11, %c0_12] : memref<4x128xf32, #tpu.memory_space<vmem>>, vector<4x128xf32>
    tpu.vector_store %arg5[%c0_11, %c0_12], %19 {strides = array<i32>} : memref<4x128xf32, #tpu.memory_space<vmem>>, vector<4x128xf32>,
    return
  }
  func.func @transform_0(%arg0: i32) -> (i32, i32) {
    %c0_i32 = arith.constant 0 : i32
    %c0_i32_0 = arith.constant 0 : i32
    return %c0_i32, %arg0 : i32, i32
  }
  func.func @transform_1(%arg0: i32) -> (i32, i32) {
    %c0_i32 = arith.constant 0 : i32
    %c0_i32_0 = arith.constant 0 : i32
    return %c0_i32, %arg0 : i32, i32
  }
  func.func @transform_2(%arg0: i32) -> (i32, i32) {
    %c0_i32 = arith.constant 0 : i32
    %c0_i32_0 = arith.constant 0 : i32
    %c0_i32_1 = arith.constant 0 : i32
    return %c0_i32, %c0_i32_0 : i32, i32
  }
  func.func @transform_3(%arg0: i32) -> (i32, i32) {
    %c0_i32 = arith.constant 0 : i32
    %c0_i32_0 = arith.constant 0 : i32
    %c0_i32_1 = arith.constant 0 : i32
    return %c0_i32, %c0_i32_0 : i32, i32
  }
  func.func @transform_4(%arg0: i32) -> (i32, i32) {
    %c0_i32 = arith.constant 0 : i32
    %c0_i32_0 = arith.constant 0 : i32
    return %c0_i32, %arg0 : i32, i32
  }
}

</mosaic_0001>

<bundles_post_ra>
// kernel: _lambda_.1
= control target key start
LH: loop header
LB: loop body
LE: loop exit
PB: predicated region body
PF: predicated region fallthrough
CT: control target
= control target key end

     0   :  { %s483_s15 = smov 0   ;;  %s485_s16 = smov 0   ;;  %s546_s0 = inlined_call_operand.vmem [shape: f32[48,288], index: 0, kind: input, shape index: {}]   ;;  %s547_s1 = inlined_call_operand.vmem [shape: f32[4,288], index: 1, kind: input, shape index: {}]   ;;  %s548_s2 = inlined_call_operand.vmem [shape: f32[8,48], index: 2, kind: input, shape index: {}]   ;;  %s549_s3 = inlined_call_operand.vmem [shape: f32[8,1], index: 3, kind: input, shape index: {}]   ;;  %s550_s4 = inlined_call_operand.vmem [shape: f32[4,288], index: 4, kind: output, shape index: {}]  }
   0x1   :  { %s487_s17 = smov 0  }
   0x2 LB: > { %s392_s18 = sadd.s32 4294967295, %s455_s17   ;;  %s500_s19 = sadd.s32 1, %s455_s17   ;;  %s455_s17 = sphi %s487_s17, %s553_s17   ;;  %s451_s16 = sphi %s485_s16, %s552_s16   ;;  %s447_s15 = sphi %s483_s15, %s551_s15  }
   0x3   : > { %s18_s20 = ssub.s32 %s455_s17, %s500_s19  ;;  %s21_s21 = sadd.s32 1, %s451_s16 }
   0x4   : > { %p19_p0 = scmp.eq.s32.totalorder %s18_s20, 0  ;;  %p28_p1 = scmp.ne.s32.totalorder %s451_s16, %s447_s15 }
   0x5   : > { %p29_p2 = scmp.eq.s32.totalorder %s455_s17, 0  ;;  %p395_p4 = scmp.ge.s32.totalorder %s455_s17, 3 }
   0x6   : > { %s509_s22 = scalar_select %p19_p0, %s451_s16, %s21_s21  }
   0x7   : > { %p30_p3 = por %p29_p2, %p28_p1  ;;  %154 = sbr.rel (%p395_p4) target bundleno = 22 (0x16), region = 24 }
   0xc   : > { %157 = sbr.rel (!%p30_p3) target bundleno = 22 (0x16), region = 28  ;;  %s159_s23 = sand.u32 (%p30_p3), 1, %s451_s16  }
   0xd   : > { %s396_s24 = sshll.u32 (%p30_p3), %s455_s17, 3  ;;  %s403_s25 = smul.u32 (%p30_p3), 48, %s159_s23 }
   0xe   : > { %s163_s28 = scalar_lea.vmem (%p30_p3), %s546_s0, %s396_s24 }
   0xf   : > { %v202_v0 = vld [vmem:[%s163_s28] sm:$0xff] (%p30_p3)  ;;  %v204_v1 = vld [vmem:[%s163_s28 + $0x18] sm:$0xff] (%p30_p3)  ;;  %v206_v2 = vld [vmem:[%s163_s28 + $0x30] sm:$0xff] (%p30_p3)  ;;  %s161_s29 = scalar_lea.vmem (%p30_p3), [#allocation2], %s403_s25 }
  0x10   : > { %203 = vst [vmem:[%s161_s29] sm:$0xff] (%p30_p3), %v202_v0  ;;  %v208_v3 = vld [vmem:[%s163_s28 + $0x48] sm:$0xff] (%p30_p3)  ;;  %v210_v4 = vld [vmem:[%s163_s28 + $0x60] sm:$0xff] (%p30_p3)  ;;  %v212_v5 = vld [vmem:[%s163_s28 + $0x78] sm:$0xff] (%p30_p3) }
  0x11   : > { %205 = vst [vmem:[%s161_s29 + $0x8] sm:$0xff] %v204_v1 }
  0x12   : > { %207 = vst [vmem:[%s161_s29 + $0x10] sm:$0xff] %v206_v2 }
  0x13   : > { %209 = vst [vmem:[%s161_s29 + $0x18] sm:$0xff] %v208_v3 }
  0x14   : > { %211 = vst [vmem:[%s161_s29 + $0x20] sm:$0xff] %v210_v4 }
  0x15   : > { %213 = vst [vmem:[%s161_s29 + $0x28] sm:$0xff] %v212_v5 }
  0x16 PF: > { %p397_p5 = scmp.ge.s32.totalorder %s455_s17, 1  ;;  %p225_p6 = scmp.lt.s32.totalorder %s455_s17, 4 }
  0x18   : > { %p226_p7 = pnand %p397_p5, %p225_p6 }
  0x19   : > { %s232_s30 = sand.u32 (!%p226_p7), 1, %s447_s15   ;;  %p260_p8 = scmp.lt.s32.totalorder (!%p226_p7), %s392_s18, 2 }
  0x1a   : > { %229 = sbr.rel (%p226_p7) target bundleno = 195 (0xc3), region = 70 }
  0x1b   : > { %s404_s7 = smul.u32 (!%p226_p7), 48, %s232_s30 }
  0x1d   : > { %s234_s8 = scalar_lea.vmem (!%p226_p7), [#allocation2], %s404_s7 }
  0x1f   : > { %v275_v6 = vld [vmem:[%s549_s3] sm:$0xff]  ;;  %v457_v7 = vmov 0   ;;  %v274_v8 = vld [vmem:[%s234_s8 + $0x28] sm:$0xff]  ;;  %v272_v10 = vld [vmem:[%s234_s8 + $0x18] sm:$0xff]  ;;  %vm281_vm0 = vcmask 392192   ;;  %s555_s18 = smov (!%p260_p8, %s392_s18), 2 }
  0x20   : > { %430 = vset.pattern.permute.xlu0 %v457_v7  ;;  %v273_v9 = vld [vmem:[%s234_s8 + $0x20] sm:$0xff]  ;;  %295 = vmatpush.msra.mxu0 %v274_v8  ;;  %v271_v11 = vld [vmem:[%s234_s8 + $0x10] sm:$0xff]  ;;  %v270_v12 = vld [vmem:[%s234_s8 + $0x8] sm:$0xff]  ;;  %s398_s11 = sshll.u32 %s555_s18, 2 }
  0x21   : > { %278 = vperm.xlu0 %430, %v275_v6   ;;  %v269_v13 = vld [vmem:[%s234_s8] sm:$0xff]  ;;  %s263_s14 = scalar_lea.vmem %s547_s1, %s398_s11  ;;  %s267_s17 = scalar_lea.vmem %s550_s4, %s398_s11 }
  0x22   : > { %296 = vmatpush.msra.mxu0 %v273_v9  ;;  %v268_v14 = vld [vmem:[%s548_s2] sm:$0xff] }
  0x23   : > { %v311_v23 = vld [vmem:[%s263_s14] sm:$0xf] }
  0x24   : > { %297 = vmatpush.msra.mxu0 %v272_v10  ;;  %v313_v24 = vrot.slane %v311_v23, 4 }
  0x26   : > { %298 = vmatpush.msra.mxu0 %v271_v11 }
  0x28   : > { %299 = vmatpush.msra.mxu0 %v270_v12 }
  0x2a   : > { %300 = vmatpush.msra.mxu0 %v269_v13 }
  0x2b   : > { %400 = vmatmul.msk.f32.vlgmr.msra.gmra.mxu0 %vm281_vm0, %v268_v14 }
  0x93   : > { %v279_v15 = vpop.permute.xlu0 %278 }
  0xa8   : > { %v302_v16 = vpop.f32.mrf.mxu0 }
  0xa9   : > { %v303_v17 = vadd.f32 %v302_v16, %v279_v15 }
  0xab   : > { %v305_v18 = vmax.f32 %v303_v17, -30.0 }
  0xad   : > { %v306_v19 = vmin.f32 %v305_v18, 20.0 }
  0xaf   : > { %v307_v20 = vmul.f32 0.5, %v306_v19 }
  0xb1   : > { %v308_v21 = vadd.f32 -1.7029247, %v307_v20 }
  0xb3   : > { %v309_v22 = vmul.f32 1.442695, %v308_v21 }
  0xb5   : > { %431 = vpow2.f32 %v309_v22 }
  0xbb   : > { %v432_v25 = vpop.eup %431 }
  0xbc   : > { %v315_v26 = vmul.f32 %v432_v25, %v313_v24 }
  0xbe   : > { %v317_v27 = vrot.slane %v315_v26, 4 }
  0xc0   : > { %v319_v28 = vadd.f32 %v317_v27, %v303_v17 }
  0xc2   : > { %320 = vst [vmem:[%s267_s17] sm:$0xf] %v319_v28 }
  0xc3 PF: > { %p11_p9 = scmp.ge.s32.totalorder %s500_s19, 5   ;;  %s551_s15 = smov %s451_s16 }
  0xc4   : > { %s552_s16 = smov %s509_s22  ;;  %s553_s17 = smov %s500_s19 }
  0xc5   :  { %13 = sbr.rel (!%p11_p9) target bundleno = 2 (0x2), region = 112 }

</bundles_post_ra>
